<compile_context>
chip_gen: v6e
topology: v6e:2x2x1
jax: 0.10.0
libtpu: 0.0.40
codegen_flags: <defaults>
</compile_context>

<pallas_src>
import functools

import jax
import jax.numpy as jnp
from jax.experimental import pallas as pl
from jax.experimental.pallas import tpu as pltpu


def adacfm_fused_kernel(x0_ref, x1_ref, tlane_ref,
                        w1_phi_ref, w1_cond_ref, b1_ref, temb_w_ref, temb_b_ref,
                        w2_ref, b2_ref, wsched_ref,
                        pred_ref, sq_ref, sched_ref):
    x0 = x0_ref[...]                       # (C, N)  x0 == cond == input
    x1 = x1_ref[...]                       # (C, N)  x1 == clean
    t = tlane_ref[...]                     # (1, N)  per-sample time, lane-broadcast

    flow = x1 - x0                         # (C, N)
    phi = x0 + t * flow                    # (C, N)  == (1-t)*x0 + t*x1

    # time-embedding bias computed in-kernel:
    #   bias[h, n] = b1[h] + tanh(temb_w[h] * time[n] + temb_b[h])   (tanh -> EUP)
    bias = b1_ref[...] + jnp.tanh(temb_w_ref[...] * t + temb_b_ref[...])   # (H, N)

    # base model on channel-concat([phi, cond]): one accumulated pair of MXU dots
    # instead of staging a (2C, N) concat through VMEM.
    h = (jnp.dot(w1_phi_ref[...], phi.astype(jnp.bfloat16),
                 preferred_element_type=jnp.float32)
         + jnp.dot(w1_cond_ref[...], x0.astype(jnp.bfloat16),
                   preferred_element_type=jnp.float32))                    # (H, N)
    h = jnp.maximum(h + bias, 0.0)
    pred = jnp.dot(w2_ref[...], h.astype(jnp.bfloat16),
                   preferred_element_type=jnp.float32)                     # (C, N)
    pred = pred + b2_ref[...]
    pred_ref[...] = pred.astype(pred_ref.dtype)

    # lane-dense partial reductions (tiny final means finished in the jitted epilogue)
    diff = pred - flow
    sq_ref[...] = jnp.sum(diff * diff, axis=0, keepdims=True)               # (1, N)
    sched_ref[...] = jnp.sum(wsched_ref[...] * phi, axis=0, keepdims=True)  # (1, N)


@functools.partial(jax.jit, static_argnames=("sigma",))
def adacfm_forward(inp, clean, key, params, sigma=0.1):
    """Returns (loss, cond, pred, time). `time` returned for the reference check."""
    B, C, L = inp.shape
    H = params["b1"].shape[0]
    N = B * L
    dtype = inp.dtype

    time = jax.random.uniform(key, (B,), dtype)               # torch.rand((batch,))

    # fold batch into the lane axis: (B, C, L) -> (C, B*L)
    def to2d(x):
        return jnp.transpose(x, (1, 0, 2)).reshape(C, N)

    x0_2d = to2d(inp)                                          # x0 == cond == input
    x1_2d = to2d(clean)
    t_lane = jnp.broadcast_to(time[:, None], (B, L)).reshape(1, N)

    vmem = pl.BlockSpec(memory_space=pltpu.MemorySpace.VMEM)

    pred2d, sq_col, sched_col = pl.pallas_call(
        adacfm_fused_kernel,
        out_shape=(jax.ShapeDtypeStruct((C, N), dtype),        # pred, lane-dense
                   jax.ShapeDtypeStruct((1, N), jnp.float32),  # sum_c (pred-flow)^2
                   jax.ShapeDtypeStruct((1, N), jnp.float32)), # sum_c w_sched*phi
        in_specs=[vmem] * 11,
        out_specs=(vmem, vmem, vmem),
    )(x0_2d, x1_2d, t_lane,
      params["w1_phi"], params["w1_cond"], params["b1"],
      params["temb_w"], params["temb_b"],
      params["w2"], params["b2"], params["sched_w"])

    # back to (B, C, L)
    pred = jnp.transpose(pred2d.reshape(C, B, L), (1, 0, 2))
    cond = inp

    # finish the loss: scheduler sigmoid over B scalars + two tiny means (jitted glue).
    # (The sigma term in the PyTorch code broadcasts a per-batch scalar over the
    #  elementwise MSE before .mean(); that equals adding sigma * mean over batch.)
    sse = jnp.sum(sq_col)
    sched_sum = jnp.sum(sched_col.reshape(B, L), axis=1)                  # (B,)
    pred_time = jax.nn.sigmoid(sched_sum / (C * L) + params["sched_b"][0])
    loss = sse / (B * C * L) + sigma * jnp.mean((pred_time - time) ** 2)
    return loss, cond, pred, time


def adacfm_forward_ref(inp, clean, time, params, sigma):
    """Pure-JAX reference mirroring the PyTorch forward (same `time`)."""
    B, C, L = inp.shape
    x0, x1, cond = inp, clean, inp
    t = time[:, None, None]
    phi = (1.0 - t) * x0 + t * x1
    flow = x1 - x0

    # adapt_scheduler: per-channel weighted global-average-pool + sigmoid -> (B,)
    pred_time = jax.nn.sigmoid(
        jnp.sum(phi * params["sched_w"][None, :, :], axis=(1, 2)) / (C * L)
        + params["sched_b"][0])

    # base model on concat([phi, cond], channel) with additive time embedding
    temb = jnp.tanh(time[:, None] * params["temb_w"][:, 0][None, :]
                    + params["temb_b"][:, 0][None, :])                     # (B, H)
    h = (jnp.einsum("hc,bcl->bhl", params["w1_phi"], phi.astype(jnp.bfloat16),
                    preferred_element_type=jnp.float32)
         + jnp.einsum("hc,bcl->bhl", params["w1_cond"], cond.astype(jnp.bfloat16),
                      preferred_element_type=jnp.float32))
    h = jnp.maximum(h + params["b1"][None] + temb[:, :, None], 0.0)
    pred = jnp.einsum("ch,bhl->bcl", params["w2"], h.astype(jnp.bfloat16),
                      preferred_element_type=jnp.float32) + params["b2"][None]

    loss = jnp.mean((pred - flow) ** 2) + sigma * jnp.mean((pred_time - time) ** 2)
    return loss, cond, pred


def init_params(key, C, H):
    ks = jax.random.split(key, 8)
    s = 0.1
    return {
        # layer-1 weight pre-split into the phi / cond halves, stored bf16 for the MXU
        "w1_phi":  (s * jax.random.normal(ks[0], (H, C), jnp.float32)).astype(jnp.bfloat16),
        "w1_cond": (s * jax.random.normal(ks[1], (H, C), jnp.float32)).astype(jnp.bfloat16),
        "b1":      s * jax.random.normal(ks[2], (H, 1), jnp.float32),
        "w2":      (s * jax.random.normal(ks[3], (C, H), jnp.float32)).astype(jnp.bfloat16),
        "b2":      s * jax.random.normal(ks[4], (C, 1), jnp.float32),
        "temb_w":  jax.random.normal(ks[5], (H, 1), jnp.float32),
        "temb_b":  jnp.linspace(0.0, 1.0, H, dtype=jnp.float32).reshape(H, 1),
        "sched_w": s * jax.random.normal(ks[6], (C, 1), jnp.float32),
        "sched_b": s * jax.random.normal(ks[7], (1,), jnp.float32),
    }


if __name__ == "__main__":
    B, C, L, H = 2, 4, 128, 32      # N = B*L = 256 (multiple of 256 -> unpadded MXU)
    SIGMA = 0.1

    key = jax.random.PRNGKey(0)
    kp, kd, kc, kt = jax.random.split(key, 4)

    params = init_params(kp, C, H)
    inp = jax.random.normal(kd, (B, C, L), jnp.float32)     # input  (== x0 == cond)
    clean = jax.random.normal(kc, (B, C, L), jnp.float32)   # clean  (== x1)

    loss, cond, pred, time = adacfm_forward(inp, clean, kt, params, sigma=SIGMA)
    jax.block_until_ready((loss, cond, pred, time))

    # correctness check against the pure-JAX reference (same `time`)
    loss_ref, cond_ref, pred_ref = adacfm_forward_ref(inp, clean, time, params, SIGMA)
    assert pred.shape == (B, C, L) and cond.shape == (B, C, L)
    assert bool(jnp.allclose(cond, cond_ref))
    assert bool(jnp.allclose(pred, pred_ref, rtol=2e-2, atol=2e-2))
    assert bool(jnp.allclose(loss, loss_ref, rtol=2e-2, atol=2e-2))

    print("KERNEL_OK")
</pallas_src>

<mosaic_0001>
module attributes {stable_mosaic.version = 11 : i64} {
  func.func @adacfm_fused_kernel(%arg0: memref<4x256xf32, #tpu.memory_space<vmem>>, %arg1: memref<4x256xf32, #tpu.memory_space<vmem>>, %arg2: memref<1x256xf32, #tpu.memory_space<vmem>>, %arg3: memref<32x4xbf16, #tpu.memory_space<vmem>>, %arg4: memref<32x4xbf16, #tpu.memory_space<vmem>>, %arg5: memref<32x1xf32, #tpu.memory_space<vmem>>, %arg6: memref<32x1xf32, #tpu.memory_space<vmem>>, %arg7: memref<32x1xf32, #tpu.memory_space<vmem>>, %arg8: memref<4x32xbf16, #tpu.memory_space<vmem>>, %arg9: memref<4x1xf32, #tpu.memory_space<vmem>>, %arg10: memref<4x1xf32, #tpu.memory_space<vmem>>, %arg11: memref<4x256xf32, #tpu.memory_space<vmem>>, %arg12: memref<1x256xf32, #tpu.memory_space<vmem>>, %arg13: memref<1x256xf32, #tpu.memory_space<vmem>>) attributes {dimension_semantics = [], scalar_prefetch = 0 : i64, scratch_operands = 0 : i64, tpu.core_type = #tpu.core_type<tc>} {
    %c0 = arith.constant 0 : index
    %c0_0 = arith.constant 0 : index
    %0 = vector.load %arg0[%c0, %c0_0] : memref<4x256xf32, #tpu.memory_space<vmem>>, vector<4x256xf32>
    %c0_1 = arith.constant 0 : index
    %c0_2 = arith.constant 0 : index
    %1 = vector.load %arg1[%c0_1, %c0_2] : memref<4x256xf32, #tpu.memory_space<vmem>>, vector<4x256xf32>
    %c0_3 = arith.constant 0 : index
    %c0_4 = arith.constant 0 : index
    %2 = vector.load %arg2[%c0_3, %c0_4] : memref<1x256xf32, #tpu.memory_space<vmem>>, vector<1x256xf32>
    %3 = arith.subf %1, %0 : vector<4x256xf32>
    %4 = vector.broadcast %2 : vector<1x256xf32> to vector<4x256xf32>
    %5 = arith.mulf %4, %3 : vector<4x256xf32>
    %6 = arith.addf %0, %5 : vector<4x256xf32>
    %c0_5 = arith.constant 0 : index
    %c0_6 = arith.constant 0 : index
    %7 = vector.load %arg5[%c0_5, %c0_6] : memref<32x1xf32, #tpu.memory_space<vmem>>, vector<32x1xf32>
    %c0_7 = arith.constant 0 : index
    %c0_8 = arith.constant 0 : index
    %8 = vector.load %arg6[%c0_7, %c0_8] : memref<32x1xf32, #tpu.memory_space<vmem>>, vector<32x1xf32>
    %9 = vector.broadcast %8 : vector<32x1xf32> to vector<32x256xf32>
    %10 = vector.broadcast %2 : vector<1x256xf32> to vector<32x256xf32>
    %11 = arith.mulf %9, %10 : vector<32x256xf32>
    %c0_9 = arith.constant 0 : index
    %c0_10 = arith.constant 0 : index
    %12 = vector.load %arg7[%c0_9, %c0_10] : memref<32x1xf32, #tpu.memory_space<vmem>>, vector<32x1xf32>
    %13 = vector.broadcast %12 : vector<32x1xf32> to vector<32x256xf32>
    %14 = arith.addf %11, %13 : vector<32x256xf32>
    %15 = math.tanh %14 : vector<32x256xf32>
    %16 = vector.broadcast %7 : vector<32x1xf32> to vector<32x256xf32>
    %17 = arith.addf %16, %15 : vector<32x256xf32>
    %c0_11 = arith.constant 0 : index
    %c0_12 = arith.constant 0 : index
    %18 = vector.load %arg3[%c0_11, %c0_12] : memref<32x4xbf16, #tpu.memory_space<vmem>>, vector<32x4xbf16>
    %19 = arith.truncf %6 : vector<4x256xf32> to vector<4x256xbf16>
    %cst = arith.constant dense<0.000000e+00> : vector<32x256xf32>
    %20 = tpu.matmul %18, %19, %cst {dimension_numbers = #tpu.dot_dimension_numbers<[1], [0], [0], [1], [0, 0, 1, 1], [], []>} : vector<32x4xbf16>, vector<4x256xbf16>, vector<32x256xf32> -> vector<32x256xf32>
    %c0_13 = arith.constant 0 : index
    %c0_14 = arith.constant 0 : index
    %21 = vector.load %arg4[%c0_13, %c0_14] : memref<32x4xbf16, #tpu.memory_space<vmem>>, vector<32x4xbf16>
    %22 = arith.truncf %0 : vector<4x256xf32> to vector<4x256xbf16>
    %cst_15 = arith.constant dense<0.000000e+00> : vector<32x256xf32>
    %23 = tpu.matmul %21, %22, %cst_15 {dimension_numbers = #tpu.dot_dimension_numbers<[1], [0], [0], [1], [0, 0, 1, 1], [], []>} : vector<32x4xbf16>, vector<4x256xbf16>, vector<32x256xf32> -> vector<32x256xf32>
    %24 = arith.addf %20, %23 : vector<32x256xf32>
    %25 = arith.addf %24, %17 : vector<32x256xf32>
    %cst_16 = arith.constant 0.000000e+00 : f32
    %26 = vector.broadcast %cst_16 : f32 to vector<32x256xf32>
    %27 = arith.maximumf %25, %26 : vector<32x256xf32>
    %c0_17 = arith.constant 0 : index
    %c0_18 = arith.constant 0 : index
    %28 = vector.load %arg8[%c0_17, %c0_18] : memref<4x32xbf16, #tpu.memory_space<vmem>>, vector<4x32xbf16>
    %29 = arith.truncf %27 : vector<32x256xf32> to vector<32x256xbf16>
    %cst_19 = arith.constant dense<0.000000e+00> : vector<4x256xf32>
    %30 = tpu.matmul %28, %29, %cst_19 {dimension_numbers = #tpu.dot_dimension_numbers<[1], [0], [0], [1], [0, 0, 1, 1], [], []>} : vector<4x32xbf16>, vector<32x256xbf16>, vector<4x256xf32> -> vector<4x256xf32>
    %c0_20 = arith.constant 0 : index
    %c0_21 = arith.constant 0 : index
    %31 = vector.load %arg9[%c0_20, %c0_21] : memref<4x1xf32, #tpu.memory_space<vmem>>, vector<4x1xf32>
    %32 = vector.broadcast %31 : vector<4x1xf32> to vector<4x256xf32>
    %33 = arith.addf %30, %32 : vector<4x256xf32>
    %c0_22 = arith.constant 0 : index
    %c0_23 = arith.constant 0 : index
    %34 = vector.load %arg11[%c0_22, %c0_23] : memref<4x256xf32, #tpu.memory_space<vmem>>, vector<4x256xf32>
    tpu.vector_store %arg11[%c0_22, %c0_23], %33 {strides = array<i32>} : memref<4x256xf32, #tpu.memory_space<vmem>>, vector<4x256xf32>,
    %35 = arith.subf %33, %3 : vector<4x256xf32>
    %36 = arith.mulf %35, %35 : vector<4x256xf32>
    %cst_24 = arith.constant dense<0.000000e+00> : vector<256xf32>
    %37 = vector.multi_reduction <add>, %36, %cst_24 [0] : vector<4x256xf32> to vector<256xf32>
    %38 = vector.shape_cast %37 : vector<256xf32> to vector<1x256xf32>
    %c0_25 = arith.constant 0 : index
    %c0_26 = arith.constant 0 : index
    %39 = vector.load %arg12[%c0_25, %c0_26] : memref<1x256xf32, #tpu.memory_space<vmem>>, vector<1x256xf32>
    tpu.vector_store %arg12[%c0_25, %c0_26], %38 {strides = array<i32>} : memref<1x256xf32, #tpu.memory_space<vmem>>, vector<1x256xf32>,
    %c0_27 = arith.constant 0 : index
    %c0_28 = arith.constant 0 : index
    %40 = vector.load %arg10[%c0_27, %c0_28] : memref<4x1xf32, #tpu.memory_space<vmem>>, vector<4x1xf32>
    %41 = vector.broadcast %40 : vector<4x1xf32> to vector<4x256xf32>
    %42 = arith.mulf %41, %6 : vector<4x256xf32>
    %cst_29 = arith.constant dense<0.000000e+00> : vector<256xf32>
    %43 = vector.multi_reduction <add>, %42, %cst_29 [0] : vector<4x256xf32> to vector<256xf32>
    %44 = vector.shape_cast %43 : vector<256xf32> to vector<1x256xf32>
    %c0_30 = arith.constant 0 : index
    %c0_31 = arith.constant 0 : index
    %45 = vector.load %arg13[%c0_30, %c0_31] : memref<1x256xf32, #tpu.memory_space<vmem>>, vector<1x256xf32>
    tpu.vector_store %arg13[%c0_30, %c0_31], %44 {strides = array<i32>} : memref<1x256xf32, #tpu.memory_space<vmem>>, vector<1x256xf32>,
    return
  }
}

</mosaic_0001>

<bundles_post_ra>
// kernel: adacfm_forward.1
= control target key start
LH: loop header
LB: loop body
LE: loop exit
PB: predicated region body
PF: predicated region fallthrough
CT: control target
= control target key end

     0   :  { %vm207_vm0 = vcmask 1041408   ;;  %v48_v2 = vlaneseq  ;;  %v583_v6 = vmov 0   ;;  %vm200_vm1 = vcmask 31744   ;;  %s804_s0 = inlined_call_operand.vmem [shape: f32[4,256], index: 0, kind: input, shape index: {}]   ;;  %s805_s1 = inlined_call_operand.vmem [shape: f32[4,256], index: 1, kind: input, shape index: {}]   ;;  %s806_s2 = inlined_call_operand.vmem [shape: f32[1,256], index: 2, kind: input, shape index: {}]   ;;  %s807_s3 = inlined_call_operand.vmem [shape: bf16[32,4], index: 3, kind: input, shape index: {}]   ;;  %s808_s4 = inlined_call_operand.vmem [shape: bf16[32,4], index: 4, kind: input, shape index: {}]   ;;  %s809_s5 = inlined_call_operand.vmem [shape: f32[32,1], index: 5, kind: input, shape index: {}]   ;;  %s810_s6 = inlined_call_operand.vmem [shape: f32[32,1], index: 6, kind: input, shape index: {}]   ;;  %s811_s7 = inlined_call_operand.vmem [shape: f32[32,1], index: 7, kind: input, shape index: {}]   ;;  %s812_s8 = inlined_call_operand.vmem [shape: bf16[4,32], index: 8, kind: input, shape index: {}]   ;;  %s813_s9 = inlined_call_operand.vmem [shape: f32[4,1], index: 9, kind: input, shape index: {}]   ;;  %s814_s10 = inlined_call_operand.vmem [shape: f32[4,1], index: 10, kind: input, shape index: {}]   ;;  %s815_s11 = inlined_call_operand.hbm [shape: f32[4,256], index: 11, kind: output, shape index: {0}]   ;;  %s816_s12 = inlined_call_operand.vmem [shape: f32[1,256], index: 12, kind: output, shape index: {1}]   ;;  %s817_s13 = inlined_call_operand.vmem [shape: f32[1,256], index: 13, kind: output, shape index: {2}]  }
   0x1   :  { %v43_v0 = vld [vmem:[%s804_s0] sm:$0xff]  ;;  %246 = vmatprep.mubr.bf16.mxu0 %v583_v6  ;;  %321 = vmatprep.mubr.bf16.mxu1 %v583_v6  ;;  %v106_v15 = vld [vmem:[%s811_s7 + $0x10] sm:$0xff]  ;;  %v107_v19 = vld [vmem:[%s811_s7 + $0x18] sm:$0xff] }
   0x2   :  { %v44_v1 = vld [vmem:[%s805_s1] sm:$0xff]  ;;  %v186_v4 = vcombine.high %v43_v0, %v43_v0  ;;  %v188_v5 = vpack.c.bf16 %v43_v0, %v43_v0  ;;  %v668_v8 = vshrl.u32 %v48_v2, 7  ;;  %539 = vset.pattern.permute.xlu1 %v583_v6  ;;  %538 = vset.pattern.permute.xlu0 %v583_v6  ;;  %v74_v16 = vld [vmem:[%s810_s6 + $0x10] sm:$0xff]  ;;  %v75_v22 = vld [vmem:[%s810_s6 + $0x18] sm:$0xff] }
   0x3   :  { %v662_v3 = vsub.f32 %v44_v1, %v43_v0  ;;  %v45_v7 = vld [vmem:[%s806_s2] sm:$0x3]  ;;  %120 = vperm.xlu1 %539, %v106_v15   ;;  %88 = vperm.xlu0 %538, %v74_v16  }
   0x4   :  { %v189_v9 = vpack.c.bf16 %v186_v4, %v186_v4  ;;  %v209_v10 = vsel %vm207_vm0, %v188_v5, 0  ;;  %v50_v11 = vsub.s32 0, %v668_v8  ;;  %v54_v12 = vsub.s32 1, %v668_v8  ;;  %v541_v14 = vld [vmem:[%s808_s4] sm:$0xff]  }
   0x5   :  { %v675_v13 = vcombine.high %v662_v3, %v662_v3 }
   0x6   :  { %526 = vmatprep.subr.msk.bf16.mxu0 %vm207_vm0, %v189_v9  ;;  %v687_v17 = vrot.slane %v45_v7, %v50_v11  ;;  %v689_v18 = vrot.slane %v45_v7, %v54_v12 }
   0x7   :  { %229 = vmatpush1.bf16.msra.mxu0 %v209_v10  ;;  %125 = vperm.xlu1 %539, %v107_v19  }
   0x8   :  { %v61_v20 = vmul.f32 %v687_v17, %v662_v3  ;;  %v62_v21 = vmul.f32 %v675_v13, %v689_v18 }
   0xa   :  { %527 = vmatmul.mubr.msk.bf16.vlgmr.msra.gmra.mxu0 %vm200_vm1, %v541_v14  ;;  %v65_v23 = vcombine.low %v61_v20, %v62_v21 }
   0xb   :  { %256 = vmatprep.mubr.bf16.mxu0 %v583_v6 }
   0xc   :  { %19 = vsyncpa [#allocation3], 0  ;;  %93 = vperm.xlu0 %538, %v75_v22   ;;  %v73_v24 = vld [vmem:[%s810_s6 + $0x8] sm:$0xff]  ;;  %v67_v25 = vadd.f32 %v65_v23, %v43_v0  ;;  %v72_v26 = vld [vmem:[%s810_s6] sm:$0xff]  ;;  %vm423_vm2 = vcmask 1043456   ;;  %vm767_vm3 = vcmp.lt.s32.totalorder %v48_v2, 256 }
   0xd   :  { %v543_v27 = vld [vmem:[%s808_s4 + $0x8] sm:$0xff]   ;;  %83 = vperm.xlu1 %539, %v73_v24   ;;  %v104_v33 = vld [vmem:[%s811_s7] sm:$0xff]  ;;  %v71_v35 = vld [vmem:[%s809_s5 + $0x18] sm:$0xff]  ;;  %v584_v12 = vmov 1966171168   ;;  %vm369_vm4 = vcmask 261120  }
   0xe   :  { %v177_v28 = vcombine.high %v67_v25, %v67_v25  ;;  %v179_v29 = vpack.c.bf16 %v67_v25, %v67_v25  ;;  %v105_v30 = vld [vmem:[%s811_s7 + $0x8] sm:$0xff]  ;;  %v542_v34 = vld [vmem:[%s807_s3] sm:$0xff]   ;;  %v70_v36 = vld [vmem:[%s809_s5 + $0x10] sm:$0xff]  ;;  %v442_v14 = vunpack.c.l.s4 %v584_v12 }
   0xf   :  { %v69_v37 = vld [vmem:[%s809_s5 + $0x8] sm:$0xff]  ;;  %v68_v38 = vld [vmem:[%s809_s5] sm:$0xff] }
  0x10   :  { %78 = vperm.xlu0 %538, %v72_v26   ;;  %v180_v31 = vpack.c.bf16 %v177_v28, %v177_v28  ;;  %v284_v32 = vsel %vm207_vm0, %v179_v29, 0  ;;  %v544_v39 = vld [vmem:[%s807_s3 + $0x8] sm:$0xff]   ;;  %v461_v40 = vld [vmem:[%s814_s10] sm:$0xf]  ;;  %v443_v21 = vunpack.c.0.s8 %v442_v14 }
  0x11   :  { %115 = vperm.xlu1 %539, %v105_v30   ;;  %v363_v41 = vld [vmem:[%s813_s9] sm:$0xf] }
  0x12   :  { %528 = vmatmul.mubr.msk.bf16.gmra.mxu0 %vm200_vm1, %v543_v27  ;;  %531 = vmatprep.subr.msk.bf16.mxu1 %vm207_vm0, %v180_v31  ;;  %v763_v26 = vsub.s32 %v443_v21, %v668_v8 }
  0x13   :  { %304 = vmatpush1.bf16.msra.mxu1 %v284_v32  ;;  %405 = vmatprep.mubr.bf16.mxu0 %v583_v6 }
  0x14   :  { %110 = vperm.xlu0 %538, %v104_v33  }
  0x15   :  { %161 = vperm.xlu1 %539, %v71_v35  }
  0x16   :  { %532 = vmatmul.mubr.msk.bf16.vlgmr.msra.gmra.mxu1 %vm200_vm1, %v542_v34 }
  0x17   :  { %331 = vmatprep.mubr.bf16.mxu1 %v583_v6 }
  0x18   :  { %156 = vperm.xlu0 %538, %v70_v36  }
  0x19   :  { %151 = vperm.xlu1 %539, %v69_v37  }
  0x1c   :  { %146 = vperm.xlu0 %538, %v68_v38  }
  0x1d   :  { %464 = vperm.xlu1 %539, %v461_v40  }
  0x1e   :  { %533 = vmatmul.mubr.msk.bf16.gmra.mxu1 %vm200_vm1, %v544_v39 }
  0x20   :  { %366 = vperm.xlu0 %538, %v363_v41  }
  0x7e   :  { %v746_v42 = vpop.permute.xlu1 %120  ;;  %v89_v43 = vpop.permute.xlu0 %88 }
  0x7f   :  { %v100_v33 = vmul.f32 %v89_v43, %v687_v17  ;;  %v101_v35 = vmul.f32 %v89_v43, %v689_v18 }
  0x81   :  { %v132_v37 = vadd.f32 %v746_v42, %v100_v33  ;;  %v133_v39 = vadd.f32 %v746_v42, %v101_v35 }
  0x82   :  { %v126_v44 = vpop.permute.xlu1 %125 }
  0x87   :  { %v94_v45 = vpop.permute.xlu0 %93 }
  0x88   :  { %v102_v46 = vmul.f32 %v94_v45, %v687_v17  ;;  %v103_v47 = vmul.f32 %v94_v45, %v689_v18  ;;  %v84_v50 = vpop.permute.xlu1 %83 }
  0x89   :  { %v98_v51 = vmul.f32 %v84_v50, %v687_v17  ;;  %v99_v52 = vmul.f32 %v84_v50, %v689_v18 }
  0x8a   :  { %v134_v48 = vadd.f32 %v126_v44, %v102_v46  ;;  %v135_v49 = vadd.f32 %v126_v44, %v103_v47 }
  0x8b   :  { %v79_v8 = vpop.permute.xlu0 %78 }
  0x8c   :  { %545 = vtanh.f32 %v134_v48  ;;  %v116_v53 = vpop.permute.xlu1 %115  ;;  %v97_v36 = vmul.f32 %v79_v8, %v689_v18  ;;  %v96_v40 = vmul.f32 %v79_v8, %v687_v17 }
  0x8d   :  { %547 = vtanh.f32 %v135_v49  ;;  %v130_v54 = vadd.f32 %v116_v53, %v98_v51  ;;  %v131_v55 = vadd.f32 %v116_v53, %v99_v52 }
  0x8f   :  { %549 = vtanh.f32 %v130_v54  ;;  %v111_v38 = vpop.permute.xlu0 %110 }
  0x90   :  { %551 = vtanh.f32 %v131_v55  ;;  %v162_v56 = vpop.permute.xlu1 %161  ;;  %v129_v41 = vadd.f32 %v111_v38, %v97_v36  ;;  %v128_v45 = vadd.f32 %v111_v38, %v96_v40 }
  0x91   :  { %553 = vtanh.f32 %v132_v37 }
  0x92   :  { %555 = vtanh.f32 %v133_v39 }
  0x93   :  { %557 = vtanh.f32 %v129_v41  ;;  %v157_v51 = vpop.permute.xlu0 %156 }
  0x94   :  { %v152_v57 = vpop.permute.xlu1 %151  ;;  %559 = vtanh.f32 %v128_v45 }
  0x98   :  { %v465_v61 = vpop.permute.xlu1 %464 }
  0x99   :  { %v546_v58 = vpop.eup %545  ;;  %v467_v63 = vmul.f32 %v465_v61, %v67_v25  ;;  %v468_v0 = vmul.f32 %v465_v61, %v177_v28 }
  0x9a   :  { %v548_v59 = vpop.eup %547  ;;  %v752_v60 = vadd.f32 %v546_v58, %v162_v56 }
  0x9b   :  { %v754_v62 = vadd.f32 %v548_v59, %v162_v56  ;;  %v469_v1 = vsel %vm423_vm2, %v467_v63, 0.0  ;;  %v476_v4 = vsel %vm423_vm2, %v468_v0, 0.0  ;;  %v147_v0 = vpop.permute.xlu0 %146 }
  0x9c   :  { %v550_v5 = vpop.eup %549  ;;  %v470_v6 = vrot.slane %v469_v1, 4  ;;  %v477_v7 = vrot.slane %v476_v4, 4 }
  0x9d   :  { %v552_v9 = vpop.eup %551  ;;  %v758_v10 = vadd.f32 %v550_v5, %v152_v57 }
  0x9e   :  { %v760_v11 = vadd.f32 %v552_v9, %v152_v57  ;;  %v471_v15 = vadd.f32 %v470_v6, %v469_v1  ;;  %v478_v16 = vadd.f32 %v477_v7, %v476_v4  ;;  %v554_v52 = vpop.eup %553 }
  0x9f   :  { %v556_v54 = vpop.eup %555  ;;  %v168_v57 = vadd.f32 %v554_v52, %v157_v51 }
  0xa0   :  { %v472_v19 = vrot.slane %v471_v15, 2  ;;  %v479_v20 = vrot.slane %v478_v16, 2  ;;  %v558_v56 = vpop.eup %557  ;;  %v169_v63 = vadd.f32 %v556_v54, %v157_v51 }
  0xa1   :  { %v165_v6 = vadd.f32 %v558_v56, %v147_v0  ;;  %v560_v14 = vpop.eup %559 }
  0xa2   :  { %v473_v22 = vadd.f32 %v472_v19, %v471_v15  ;;  %v480_v23 = vadd.f32 %v479_v20, %v478_v16 }
  0xa4   :  { %v474_v24 = vrot.slane %v473_v22, 1  ;;  %v481_v25 = vrot.slane %v480_v23, 1 }
  0xa6   :  { %v475_v27 = vadd.f32 %v474_v24, %v473_v22  ;;  %v482_v28 = vadd.f32 %v481_v25, %v480_v23 }
  0xa8   :  { %v485_v29 = vcombine.low %v475_v27, %v482_v28  ;;  %v164_v27 = vadd.f32 %v560_v14, %v147_v0 }
  0xaa   :  { %v492_v30 = vrot.slane %v485_v29, %v763_v26 }
  0xac   :  { %v499_v32 = vrot.slane %v492_v30, %v763_v26 }
  0xae   :  { %501 = vst.msk [vmem:[%s817_s13] sm:$0x3] %vm767_vm3, %v499_v32  ;;  %s585_s13 = smov [#allocation2]  }
  0xaf   :  { %s508_s24 = sshll.u32 %s585_s13, 4  ;;  %s509_s24 = int_to_ptr.vmem [resolvable:$true] %s508_s24 }
  0xb0   :  { %p566_p1 = scmp.lt.s32.totalorder %s509_s24, %s509_s24 }
  0xca   :  { %v248_v34 = vpop.f32.mrf.mxu0 }
  0xcc   :  { %v250_v2 = vpop.f32.mrf.mxu0 }
  0xce   :  { %v252_v44 = vpop.f32.mrf.mxu0 }
  0xd0   :  { %v254_v46 = vpop.f32.mrf.mxu0 }
  0xd2   :  { %v258_v43 = vpop.f32.mrf.mxu0 }
  0xd4   :  { %v260_v49 = vpop.f32.mrf.mxu0 }
  0xd6   :  { %v323_v47 = vpop.f32.mrf.mxu1  ;;  %v262_v17 = vpop.f32.mrf.mxu0 }
  0xd7   :  { %v324_v21 = vadd.f32 %v323_v47, %v248_v34 }
  0xd8   :  { %v325_v48 = vpop.f32.mrf.mxu1  ;;  %v264_v9 = vpop.f32.mrf.mxu0 }
  0xd9   :  { %v326_v1 = vadd.f32 %v325_v48, %v250_v2  ;;  %v342_v33 = vadd.f32 %v324_v21, %v164_v27 }
  0xda   :  { %v327_v18 = vpop.f32.mrf.mxu1 }
  0xdb   :  { %v328_v7 = vadd.f32 %v327_v18, %v252_v44  ;;  %v343_v22 = vadd.f32 %v326_v1, %v165_v6  ;;  %v350_v2 = vmax.f32 %v342_v33, 0.0 }
  0xdc   :  { %v329_v50 = vpop.f32.mrf.mxu1 }
  0xdd   :  { %v330_v58 = vadd.f32 %v329_v50, %v254_v46  ;;  %v344_v28 = vadd.f32 %v328_v7, %v758_v10  ;;  %v351_v35 = vmax.f32 %v343_v22, 0.0  ;;  %v367_v10 = vpop.permute.xlu0 %366 }
  0xde   :  { %v333_v53 = vpop.f32.mrf.mxu1 }
  0xdf   :  { %v334_v42 = vadd.f32 %v333_v53, %v258_v43  ;;  %v345_v15 = vadd.f32 %v330_v58, %v760_v11  ;;  %v352_v36 = vmax.f32 %v344_v28, 0.0 }
  0xe0   :  { %v335_v55 = vpop.f32.mrf.mxu1 }
  0xe1   :  { %v336_v59 = vadd.f32 %v335_v55, %v260_v49  ;;  %v346_v4 = vadd.f32 %v334_v42, %v168_v57  ;;  %v353_v29 = vmax.f32 %v345_v15, 0.0  ;;  %v359_v34 = vpack.c.bf16 %v352_v36, %v350_v2 }
  0xe2   :  { %v337_v61 = vpop.f32.mrf.mxu1 }
  0xe3   :  { %v338_v5 = vadd.f32 %v337_v61, %v262_v17  ;;  %v347_v16 = vadd.f32 %v336_v59, %v169_v63  ;;  %v354_v23 = vmax.f32 %v346_v4, 0.0 }
  0xe4   :  { %v339_v12 = vpop.f32.mrf.mxu1 }
  0xe5   :  { %v348_v19 = vadd.f32 %v338_v5, %v752_v60  ;;  %v340_v20 = vadd.f32 %v339_v12, %v264_v9  ;;  %v355_v30 = vmax.f32 %v347_v16, 0.0  ;;  %v360_v60 = vpack.c.bf16 %v353_v29, %v351_v35 }
  0xe7   :  { %v356_v24 = vmax.f32 %v348_v19, 0.0  ;;  %v349_v25 = vadd.f32 %v340_v20, %v754_v62  ;;  %v358_v62 = vld [vmem:[%s812_s8] sm:$0x3]  ;;  %s561_s8 = scalar_lea.vmem %s509_s24, 128 }
  0xe8   :  { %p562_p0 = scmp.ne.s32.totalorder %s509_s24, %s561_s8  ;;  %p567_p2 = scmp.lt.s32.totalorder %s561_s8, %s561_s8 }
  0xe9   :  { %v361_v32 = vpack.c.bf16 %v356_v24, %v354_v23  ;;  %v357_v8 = vmax.f32 %v349_v25, 0.0 }
  0xea   :  { %p568_p3 = por %p567_p2, %p566_p1 }
  0xeb   :  { %v362_v11 = vpack.c.bf16 %v357_v8, %v355_v30 }
  0xec   :  { %p569_p4 = pnand %p568_p3, %p562_p0 }
  0xed   :  { %385 = vmatprep.subr.bf16.mxu0 %v362_v11 }
  0xee   :  { %386 = vmatpush1.bf16.msra.mxu0 %v361_v32 }
  0xef   :  { %387 = vmatprep.subr.bf16.mxu0 %v360_v60 }
  0xf2   :  { %388 = vmatpush1.bf16.msra.mxu0 %v359_v34 }
  0xf5   :  { %534 = vmatmul.mubr.msk.bf16.vlgmr.msra.gmra.mxu0 %vm369_vm4, %v358_v62 }
 0x1b5   :  { %v407_v37 = vpop.f32.mrf.mxu0 }
 0x1b6   :  { %v408_v38 = vadd.f32 %v407_v37, %v367_v10 }
 0x1b7   :  { %v409_v39 = vpop.f32.mrf.mxu0 }
 0x1b8   :  { %v419_v40 = vsub.f32 %v408_v38, %v662_v3  ;;  %v410_v41 = vadd.f32 %v409_v39, %v367_v10 }
 0x1b9   :  { %v411_v44 = vpop.f32.mrf.mxu0 }
 0x1ba   :  { %v421_v45 = vmul.f32 %v419_v40, %v419_v40  ;;  %v420_v46 = vsub.f32 %v410_v41, %v675_v13  ;;  %v416_v47 = vcombine.low %v408_v38, %v410_v41 }
 0x1bb   :  { %v412_v43 = vpop.f32.mrf.mxu0 }
 0x1bc   :  { %v424_v48 = vsel %vm423_vm2, %v421_v45, 0.0  ;;  %v422_v18 = vmul.f32 %v420_v46, %v420_v46  ;;  %418 = vst [vmem:[#allocation2] sm:$0xff] %v416_v47 }
 0x1bd   :  { %v425_v49 = vrot.slane %v424_v48, 4 }
 0x1be   :  { %572 = shalt.err (!%p569_p4)
}
 0x1bf   :  { %511 = dma.vmem_to_hbm [thread:$0]  %s509_s24, 128, %s815_s11, [#allocation3]   ;;  %v431_v3 = vsel %vm423_vm2, %v422_v18, 0.0  ;;  %v426_v13 = vadd.f32 %v425_v49, %v424_v48 }
 0x1c0   :  { %v432_v50 = vrot.slane %v431_v3, 4 }
 0x1c1   :  { %v427_v51 = vrot.slane %v426_v13, 2 }
 0x1c2   :  { %v433_v52 = vadd.f32 %v432_v50, %v431_v3 }
 0x1c3   :  { %v428_v53 = vadd.f32 %v427_v51, %v426_v13 }
 0x1c4   :  { %v434_v42 = vrot.slane %v433_v52, 2 }
 0x1c5   :  { %v429_v54 = vrot.slane %v428_v53, 1 }
 0x1c6   :  { %v435_v17 = vadd.f32 %v434_v42, %v433_v52 }
 0x1c7   :  { %v430_v56 = vadd.f32 %v429_v54, %v428_v53 }
 0x1c8   :  { %v436_v55 = vrot.slane %v435_v17, 1 }
 0x1ca   :  { %v437_v57 = vadd.f32 %v436_v55, %v435_v17 }
 0x1cc   :  { %v440_v58 = vcombine.low %v430_v56, %v437_v57 }
 0x1ce   :  { %v447_v59 = vrot.slane %v440_v58, %v763_v26 }
 0x1d0   :  { %v454_v61 = vrot.slane %v447_v59, %v763_v26 }
 0x1d2   :  { %460 = vst.msk [vmem:[%s816_s12] sm:$0x3] %vm767_vm3, %v454_v61 }
 0x1d3   :  { %581 = dma.done.wait [#allocation3], 128  }
 0x1d4   :  { %582 = vsyncadd [#allocation3], 4294967168 }
 0x1d5   :  { %523 = vsyncpa [#allocation3], 1 }

</bundles_post_ra>
